<compile_context>
chip_gen: v7x
topology: tpu7x:2x2x1
jax: 0.10.0
libtpu: 0.0.40
codegen_flags: <defaults>
</compile_context>

<pallas_src>
import functools

import jax
import jax.numpy as jnp
from jax import lax
from jax.experimental import pallas as pl
from jax.experimental.pallas import tpu as pltpu

_SUBLANE = 8


# ---------------------------------------------------------------------------
# Hardware queries (best-effort, always safe to fail).
# ---------------------------------------------------------------------------
def _vmem_limit_bytes():
    """Scoped-VMEM limit: 64 MiB on 128-MiB parts (v5e/v6e), else 32 MiB (v7x-safe)."""
    limit = 32 * 1024 * 1024
    try:
        if int(pltpu.get_tpu_info().vmem_capacity_bytes) >= 128 * 1024 * 1024:
            limit = 64 * 1024 * 1024
    except Exception:
        pass
    return limit


def _num_tensorcores():
    """TensorCores per JAX device: 2 on v7x, 1 on v5e/v6e (best-effort query)."""
    try:
        info = pltpu.get_tpu_info()
        for name in ("num_tensorcores", "tensorcore_count", "num_cores", "core_count"):
            v = getattr(info, name, None)
            if v:
                return max(1, min(2, int(v)))
    except Exception:
        pass
    try:
        kind = jax.devices()[0].device_kind.lower()
        if "7" in kind:  # v7x-class parts have 2 TensorCores per device
            return 2
    except Exception:
        pass
    return 1


# ---------------------------------------------------------------------------
# Tiling helpers.
# ---------------------------------------------------------------------------
def _sublane_multiple(dtype):
    # Sub-32-bit dtypes pack along sublanes: f32 -> 8 rows/vreg, bf16 -> 16, int8 -> 32.
    itemsize = jnp.dtype(dtype).itemsize
    return _SUBLANE * max(1, 4 // itemsize)


def _row_cost_bytes(hw, dtype):
    # Per-row VMEM: in + out blocks double-buffered in the native dtype, plus
    # ~3 fp32 temporaries (cast copy, centered, squares) inside the body.
    itemsize = jnp.dtype(dtype).itemsize
    return hw * (4 * itemsize + 3 * 4)


def _choose_row_tile(rows, hw, dtype, budget_bytes, num_tc):
    """Sublane-aligned row tile for the single-block (full-H*W) path."""
    sub = _sublane_multiple(dtype)
    per_row = _row_cost_bytes(hw, dtype)
    tile = max(sub, (budget_bytes // max(per_row, 1)) // sub * sub)
    if tile >= rows:
        # Whole problem fits in one block.  Split only when the chip really has
        # 2 TensorCores (v7x); on single-TC v5e/v6e an extra grid step is pure
        # per-step overhead.  A full-dim row block is always a legal BlockSpec.
        if num_tc > 1 and rows > sub:
            return max(sub, pl.cdiv(pl.cdiv(rows, num_tc), sub) * sub)
        return rows
    return tile


def _choose_chunk_tiles(rows, hw, dtype, hw_tile):
    """(row_tile, hw_tile) for the chunked (large-H*W) path."""
    itemsize = jnp.dtype(dtype).itemsize
    sub = _sublane_multiple(dtype)
    tile_r = 8 * sub
    if tile_r >= rows:
        tile_r = rows  # full-dim row block: always legal
    if hw_tile is None:
        # ~2 MiB native-dtype x block per grid step, lane-aligned.
        hw_tile = max(128, (2 * 1024 * 1024) // max(tile_r * itemsize, 1) // 128 * 128)
    if hw_tile >= hw:
        hw_tile = hw  # single full-width chunk (always legal)
    else:
        hw_tile = max(128, (hw_tile // 128) * 128)  # partial chunks must be lane-aligned
        if hw_tile >= hw:
            hw_tile = hw
    return tile_r, hw_tile


# ---------------------------------------------------------------------------
# Single-block path: one (row_tile, H*W) block per grid step.
# ---------------------------------------------------------------------------
def _normalize_kernel(x_ref, o_ref, *, inv_hw, inv_nm1):
    # Rows are independent (one per (n, c)); the reduction runs on the lane axis.
    x = x_ref[...].astype(jnp.float32)
    # Two-pass, VMEM-resident statistics: mean first, then centered sum of
    # squares.  Reductions hit the XLU, rsqrt the EUP; all hidden under DMA.
    mean = jnp.sum(x, axis=-1, keepdims=True) * jnp.float32(inv_hw)
    centered = x - mean
    var = jnp.sum(centered * centered, axis=-1, keepdims=True) * jnp.float32(inv_nm1)
    inv_std = lax.rsqrt(var)
    o_ref[...] = (centered * inv_std).astype(o_ref.dtype)


# ---------------------------------------------------------------------------
# Chunked path (large H*W): pass 1 accumulates per-row (mean, M2) across lane
# chunks with Chan's parallel-merge formula; pass 2 applies the normalization.
# ---------------------------------------------------------------------------
def _stats_kernel(x_ref, mean_ref, inv_std_ref, mean_acc, m2_acc, *,
                  hw, hw_tile, inv_nm1):
    j = pl.program_id(1)

    @pl.when(j == 0)
    def _():
        mean_acc[...] = jnp.zeros_like(mean_acc)
        m2_acc[...] = jnp.zeros_like(m2_acc)

    x = x_ref[...].astype(jnp.float32)

    if hw % hw_tile == 0:
        mask = None
        n_b = jnp.float32(hw_tile)
        xm = x
    else:
        # Ragged last chunk: mask lanes beyond the true end of the row.
        valid = jnp.minimum(hw - j * hw_tile, hw_tile)
        mask = lax.broadcasted_iota(jnp.int32, x.shape, 1) < valid
        n_b = valid.astype(jnp.float32)
        xm = jnp.where(mask, x, 0.0)

    chunk_mean = jnp.sum(xm, axis=-1, keepdims=True) / n_b
    centered = x - chunk_mean
    if mask is not None:
        centered = jnp.where(mask, centered, 0.0)
    chunk_m2 = jnp.sum(centered * centered, axis=-1, keepdims=True)

    # Chan et al. merge of (mean, M2) with the running accumulator.
    n_a = (j * hw_tile).astype(jnp.float32)
    n_ab = n_a + n_b
    delta = chunk_mean - mean_acc[...]
    mean_acc[...] = mean_acc[...] + delta * (n_b / n_ab)
    m2_acc[...] = m2_acc[...] + chunk_m2 + delta * delta * (n_a * n_b / n_ab)

    @pl.when(j == pl.num_programs(1) - 1)
    def _():
        mean_ref[...] = mean_acc[...]
        inv_std_ref[...] = lax.rsqrt(m2_acc[...] * jnp.float32(inv_nm1))


def _apply_kernel(x_ref, mean_ref, inv_std_ref, o_ref):
    x = x_ref[...].astype(jnp.float32)
    o_ref[...] = ((x - mean_ref[...]) * inv_std_ref[...]).astype(o_ref.dtype)


def _normalize_chunked(x2d, rows, hw, tile_r, hw_tile, vmem_limit, inv_nm1,
                       donate_input):
    row_grid = pl.cdiv(rows, tile_r)
    hw_grid = pl.cdiv(hw, hw_tile)

    mean, inv_std = pl.pallas_call(
        functools.partial(_stats_kernel, hw=hw, hw_tile=hw_tile, inv_nm1=inv_nm1),
        out_shape=(jax.ShapeDtypeStruct((rows, 1), jnp.float32),
                   jax.ShapeDtypeStruct((rows, 1), jnp.float32)),
        grid_spec=pltpu.PrefetchScalarGridSpec(
            num_scalar_prefetch=0,
            grid=(row_grid, hw_grid),
            in_specs=[pl.BlockSpec((tile_r, hw_tile), lambda i, j: (i, j))],
            out_specs=[pl.BlockSpec((tile_r, 1), lambda i, j: (i, 0)),
                       pl.BlockSpec((tile_r, 1), lambda i, j: (i, 0))],
            scratch_shapes=[pltpu.VMEM((tile_r, 1), jnp.float32),
                            pltpu.VMEM((tile_r, 1), jnp.float32)]),
        compiler_params=pltpu.CompilerParams(
            dimension_semantics=("parallel", "arbitrary"),
            vmem_limit_bytes=vmem_limit),
    )(x2d)

    out2d = pl.pallas_call(
        _apply_kernel,
        out_shape=jax.ShapeDtypeStruct((rows, hw), x2d.dtype),
        grid_spec=pltpu.PrefetchScalarGridSpec(
            num_scalar_prefetch=0,
            grid=(row_grid, hw_grid),
            in_specs=[pl.BlockSpec((tile_r, hw_tile), lambda i, j: (i, j)),
                      pl.BlockSpec((tile_r, 1), lambda i, j: (i, 0)),
                      pl.BlockSpec((tile_r, 1), lambda i, j: (i, 0))],
            out_specs=pl.BlockSpec((tile_r, hw_tile), lambda i, j: (i, j))),
        compiler_params=pltpu.CompilerParams(
            dimension_semantics=("parallel", "parallel"),
            vmem_limit_bytes=vmem_limit),
        input_output_aliases={0: 0} if donate_input else {},
    )(x2d, mean, inv_std)
    return out2d


# ---------------------------------------------------------------------------
# Public wrapper.
# ---------------------------------------------------------------------------
def normalize_input(x, *, row_tile=None, hw_tile=None, donate_input=False):
    """x: (N, C, H, W) -> (N, C, H, W), normalized per (n, c) over H*W."""
    n, c, h, w = x.shape
    hw = h * w
    rows = n * c
    x2d = x.reshape(rows, hw)

    # torch.std default is unbiased (ddof=1); hw == 1 yields NaN, same as torch.
    inv_nm1 = 1.0 / (hw - 1) if hw > 1 else float("nan")

    vmem_limit = _vmem_limit_bytes()
    budget = vmem_limit // 2
    num_tc = _num_tensorcores()

    single_block_fits = (
        hw_tile is None
        and _row_cost_bytes(hw, x.dtype) * _sublane_multiple(x.dtype) <= budget
    )

    if single_block_fits:
        tile = row_tile if row_tile is not None else _choose_row_tile(
            rows, hw, x.dtype, budget, num_tc)
        grid = (pl.cdiv(rows, tile),)  # no padding copy; boundary block masked
        out2d = pl.pallas_call(
            functools.partial(_normalize_kernel, inv_hw=1.0 / hw, inv_nm1=inv_nm1),
            out_shape=jax.ShapeDtypeStruct((rows, hw), x.dtype),
            grid_spec=pltpu.PrefetchScalarGridSpec(
                num_scalar_prefetch=0,
                grid=grid,
                in_specs=[pl.BlockSpec((tile, hw), lambda i: (i, 0))],
                out_specs=pl.BlockSpec((tile, hw), lambda i: (i, 0))),
            compiler_params=pltpu.CompilerParams(
                dimension_semantics=("parallel",),
                vmem_limit_bytes=vmem_limit),
            input_output_aliases={0: 0} if donate_input else {},
        )(x2d)
    else:
        tile_r, hw_tile = _choose_chunk_tiles(rows, hw, x.dtype, hw_tile)
        if row_tile is not None:
            tile_r = row_tile
        out2d = _normalize_chunked(x2d, rows, hw, tile_r, hw_tile, vmem_limit,
                                   inv_nm1, donate_input)

    return out2d.reshape(n, c, h, w)


# ---------------------------------------------------------------------------
# Pure-JAX reference mirroring the PyTorch module (two-pass, ddof=1).
# ---------------------------------------------------------------------------
def _reference(x):
    n, c, h, w = x.shape
    flat = x.reshape(n, c, h * w).astype(jnp.float32)
    mean = flat.mean(axis=2, keepdims=True)
    var = jnp.sum((flat - mean) ** 2, axis=2, keepdims=True) / (h * w - 1)
    out = (flat - mean) / jnp.sqrt(var)
    return out.reshape(n, c, h, w).astype(x.dtype)


if __name__ == "__main__":
    key = jax.random.PRNGKey(0)
    k1, k2, k3, k4 = jax.random.split(key, 4)

    # Primary shape from the module spec.
    x = jax.random.normal(k1, (2, 4, 16, 16), dtype=jnp.float32) * 3.0 + 1.5
    out = jax.block_until_ready(normalize_input(x))
    ref = _reference(x)
    assert out.shape == x.shape and out.dtype == x.dtype
    assert jnp.allclose(out, ref, atol=1e-4, rtol=1e-4), "mismatch (16x16 f32)"

    # Uneven row count (rows=12) and non-128-multiple spatial size (196).
    x2 = jax.random.normal(k2, (4, 3, 14, 14), dtype=jnp.float32) * 0.7 - 2.0
    out2 = jax.block_until_ready(normalize_input(x2))
    assert out2.shape == x2.shape and out2.dtype == x2.dtype
    assert jnp.allclose(out2, _reference(x2), atol=1e-4, rtol=1e-4), "mismatch (14x14 f32)"

    # Force the chunked (large-H*W) path: 2 lane chunks with a ragged tail.
    out2c = jax.block_until_ready(normalize_input(x2, hw_tile=128))
    assert jnp.allclose(out2c, _reference(x2), atol=1e-4, rtol=1e-4), "mismatch (chunked)"

    # bf16 input: exercises sublane-packed tiling + fp32-temp VMEM accounting.
    x3 = (jax.random.normal(k3, (2, 4, 16, 16), dtype=jnp.float32) * 2.0 + 0.5
          ).astype(jnp.bfloat16)
    out3 = jax.block_until_ready(normalize_input(x3))
    assert out3.dtype == jnp.bfloat16
    assert jnp.allclose(out3.astype(jnp.float32),
                        _reference(x3).astype(jnp.float32),
                        atol=3e-2, rtol=3e-2), "mismatch (bf16)"

    # Larger case: multi-row tiles, 128-multiple spatial axis.
    x4 = jax.random.normal(k4, (8, 16, 32, 32), dtype=jnp.float32) * 5.0 - 3.0
    out4 = jax.block_until_ready(normalize_input(x4))
    assert jnp.allclose(out4, _reference(x4), atol=1e-4, rtol=1e-4), "mismatch (32x32)"

    print("KERNEL_OK")
</pallas_src>

<mosaic_0001>
module attributes {stable_mosaic.version = 11 : i64} {
  func.func @_normalize_kernel(%arg0: i32, %arg1: memref<8x256xf32, #tpu.memory_space<vmem>>, %arg2: memref<8x256xf32, #tpu.memory_space<vmem>>) attributes {dimension_semantics = [#tpu.dimension_semantics<parallel>], iteration_bounds = array<i64: 1>, scalar_prefetch = 0 : i64, scratch_operands = 0 : i64, tpu.core_type = #tpu.core_type<tc>, window_params = [{transform_indices = @transform_0, window_bounds = array<i64: 8, 256>}, {transform_indices = @transform_1, window_bounds = array<i64: 8, 256>}]} {
    %c0 = arith.constant 0 : index
    %c0_0 = arith.constant 0 : index
    %0 = vector.load %arg1[%c0, %c0_0] : memref<8x256xf32, #tpu.memory_space<vmem>>, vector<8x256xf32>
    %cst = arith.constant dense<0.000000e+00> : vector<8xf32>
    %1 = vector.multi_reduction <add>, %0, %cst [1] : vector<8x256xf32> to vector<8xf32>
    %2 = vector.shape_cast %1 : vector<8xf32> to vector<8x1xf32>
    %cst_1 = arith.constant 3.906250e-03 : f32
    %3 = vector.broadcast %cst_1 : f32 to vector<8x1xf32>
    %4 = arith.mulf %2, %3 : vector<8x1xf32>
    %5 = vector.broadcast %4 : vector<8x1xf32> to vector<8x256xf32>
    %6 = arith.subf %0, %5 : vector<8x256xf32>
    %7 = arith.mulf %6, %6 : vector<8x256xf32>
    %cst_2 = arith.constant dense<0.000000e+00> : vector<8xf32>
    %8 = vector.multi_reduction <add>, %7, %cst_2 [1] : vector<8x256xf32> to vector<8xf32>
    %9 = vector.shape_cast %8 : vector<8xf32> to vector<8x1xf32>
    %cst_3 = arith.constant 0.00392156886 : f32
    %10 = vector.broadcast %cst_3 : f32 to vector<8x1xf32>
    %11 = arith.mulf %9, %10 : vector<8x1xf32>
    %12 = math.rsqrt %11 : vector<8x1xf32>
    %13 = vector.broadcast %12 : vector<8x1xf32> to vector<8x256xf32>
    %14 = arith.mulf %6, %13 : vector<8x256xf32>
    %c0_4 = arith.constant 0 : index
    %c0_5 = arith.constant 0 : index
    %15 = vector.load %arg2[%c0_4, %c0_5] : memref<8x256xf32, #tpu.memory_space<vmem>>, vector<8x256xf32>
    tpu.vector_store %arg2[%c0_4, %c0_5], %14 {strides = array<i32>} : memref<8x256xf32, #tpu.memory_space<vmem>>, vector<8x256xf32>,
    return
  }
  func.func @transform_0(%arg0: i32) -> (i32, i32) {
    %c0_i32 = arith.constant 0 : i32
    %c0_i32_0 = arith.constant 0 : i32
    return %arg0, %c0_i32 : i32, i32
  }
  func.func @transform_1(%arg0: i32) -> (i32, i32) {
    %c0_i32 = arith.constant 0 : i32
    %c0_i32_0 = arith.constant 0 : i32
    return %arg0, %c0_i32 : i32, i32
  }
}

</mosaic_0001>

<bundles_post_ra>
// kernel: tpu_custom_call.1
= control target key start
LH: loop header
LB: loop body
LE: loop exit
PB: predicated region body
PF: predicated region fallthrough
CT: control target
= control target key end

     0   :  { %6 = vsyncpa [#allocation3], 0  ;;  %s143_s0 = inlined_call_operand.hbm [shape: f32[8,256], index: 0, kind: input, shape index: {}]   ;;  %s144_s1 = inlined_call_operand.hbm [shape: f32[8,256], index: 1, kind: output, shape index: {}]  }
   0x1   :  { %7 = vsyncpa [#allocation4], 0  ;;  %s107_s6 = smov [#allocation2]   ;;  %s59_s10 = scalar_lea.hbm %s143_s0, 256 }
   0x2   :  { %s14_s7 = sshll.u32 %s107_s6, 4  ;;  %p60_p0 = scmp.ne.s32.totalorder %s143_s0, %s59_s10  ;;  %s15_s7 = int_to_ptr.vmem [resolvable:$true] %s14_s7 }
   0x3   :  { %p63_p1 = scmp.lt.u32.totalorder %s59_s10, %s143_s0 }
   0x5   :  { %p65_p2 = pnand %p63_p1, %p60_p0 }
   0x7   :  { %68 = shalt.err (!%p65_p2)
}
   0x8   :  { %s69_s15 = scalar_lea.vmem %s15_s7, 256  ;;  %p74_p4 = scmp.lt.s32.totalorder %s15_s7, %s15_s7 }
   0x9   :  { %p70_p3 = scmp.ne.s32.totalorder %s15_s7, %s69_s15  ;;  %p75_p5 = scmp.lt.s32.totalorder %s69_s15, %s69_s15 }
   0xb   :  { %p76_p6 = por %p75_p5, %p74_p4 }
   0xd   :  { %p77_p7 = pnand %p76_p6, %p70_p3 }
   0xf   :  { %80 = shalt.err (!%p77_p7)
}
  0x10   :  { %17 = dma.hbm_to_vmem [thread:$0]  %s143_s0, 256, %s15_s7, [#allocation3]  }
  0x11   :  { %103 = dma.done.wait [#allocation3], 256  }
  0x12   :  { %104 = vsyncadd [#allocation3], 4294967040  ;;  %v21_v0 = vld [vmem:[#allocation2] sm:$0xff]  ;;  %v22_v1 = vld [vmem:[#allocation2 + $0x8] sm:$0xff]  ;;  %s108_s18 = smov [#allocation5]  }
  0x13   :  { %v23_v2 = vadd.f32 %v22_v1, %v21_v0  ;;  %s46_s19 = sshll.u32 %s108_s18, 4  ;;  %s47_s19 = int_to_ptr.vmem [resolvable:$true] %s46_s19 }
  0x14   :  { %s81_s0 = scalar_lea.vmem %s47_s19, 256  ;;  %p86_p9 = scmp.lt.s32.totalorder %s47_s19, %s47_s19 }
  0x15   :  { %24 = vadd.xlane.f32.xlu0 %v23_v2  ;;  %p82_p8 = scmp.ne.s32.totalorder %s47_s19, %s81_s0  ;;  %p87_p10 = scmp.lt.s32.totalorder %s81_s0, %s81_s0 }
  0x17   :  { %p88_p11 = por %p87_p10, %p86_p9 }
  0x19   :  { %p89_p12 = pnand %p88_p11, %p82_p8 }
  0xa2   :  { %v25_v3 = vpop.xlane.xlu0 %24 }
  0xa3   :  { %v26_v4 = vmul.f32 0.00390625, %v25_v3 }
  0xa5   :  { %v27_v5 = vsub.f32 %v21_v0, %v26_v4  ;;  %v28_v6 = vsub.f32 %v22_v1, %v26_v4 }
  0xa7   :  { %v29_v7 = vmul.f32 %v27_v5, %v27_v5  ;;  %v30_v8 = vmul.f32 %v28_v6, %v28_v6 }
  0xa9   :  { %v31_v9 = vadd.f32 %v30_v8, %v29_v7 }
  0xab   :  { %32 = vadd.xlane.f32.xlu0 %v31_v9 }
 0x138   :  { %v33_v10 = vpop.xlane.xlu0 %32 }
 0x139   :  { %v34_v11 = vmul.f32 0.003921569, %v33_v10 }
 0x13b   :  { %57 = vrsqrt.f32 %v34_v11 }
 0x145   :  { %v58_v12 = vpop.eup %57 }
 0x146   :  { %v36_v13 = vmul.f32 %v58_v12, %v27_v5  ;;  %v37_v14 = vmul.f32 %v58_v12, %v28_v6 }
 0x148   :  { %38 = vst [vmem:[#allocation5] sm:$0xff] %v36_v13  ;;  %39 = vst [vmem:[#allocation5 + $0x8] sm:$0xff] %v37_v14 }
 0x149   :  { %92 = shalt.err (!%p89_p12)
}
 0x14a   :  { %s93_s22 = scalar_lea.hbm %s144_s1, 256 }
 0x14b   :  { %p94_p13 = scmp.ne.s32.totalorder %s144_s1, %s93_s22  ;;  %p97_p0 = scmp.lt.u32.totalorder %s93_s22, %s144_s1 }
 0x14d   :  { %p99_p1 = pnand %p97_p0, %p94_p13 }
 0x14f   :  { %102 = shalt.err (!%p99_p1)
}
 0x150   :  { %49 = dma.vmem_to_hbm [thread:$0]  %s47_s19, 256, %s144_s1, [#allocation4]  }
 0x151   :  { %105 = dma.done.wait [#allocation4], 256  }
 0x152   :  { %106 = vsyncadd [#allocation4], 4294967040 }
 0x153   :  { %53 = vsyncpa [#allocation3], 1 }
 0x154   :  { %54 = vsyncpa [#allocation4], 1 }

</bundles_post_ra>
